<compile_context>
chip_gen: v5e
topology: v5e:2x2
jax: 0.10.0
libtpu: 0.0.40
codegen_flags: <defaults>
</compile_context>

<pallas_src>
import functools

import jax
import jax.numpy as jnp
from jax.experimental import pallas as pl
from jax.experimental.pallas import tpu as pltpu

LANE = 128
MAX_TILE_ROWS = 8192            # 8192*128*4B = 4 MiB per f32 input tile
SUB_ROWS = 512                  # inner-loop sub-chunk (256 KiB f32)
NCORES = 2                      # partial-sum blocks for the v7x 2-TC split
VMEM_LIMIT_BYTES = 32 * 1024 * 1024


def _pick_sub_rows(tile_rows, min_align):
    """Largest sub-chunk (<=SUB_ROWS) dividing tile_rows, aligned for packed dtypes."""
    for cand in (SUB_ROWS, 256, 128, 64, 32, 16, 8):
        if min_align <= cand <= tile_rows and tile_rows % cand == 0:
            return cand
    return tile_rows  # tiny odd tile: single pass over the whole tile


def _bce_kernel(x_ref, t_ref, out_ref, *, eps, tile_rows, sub_rows,
                n_per_core, n_blocks, valid_rows, has_ragged):
    c = pl.program_id(0)          # core / partial-sum index ("parallel")
    i = pl.program_id(1)          # streaming tile index     ("arbitrary")

    # Zero the resident (8,128) accumulator at the start of each core's sweep.
    @pl.when(i == 0)
    def _():
        out_ref[...] = jnp.zeros_like(out_ref)

    n_sub = tile_rows // sub_rows
    unroll = True if n_sub <= 8 else 4
    tile_idx = c * n_per_core + i

    def sweep(masked):
        def body(s, carry):
            r0 = pl.multiple_of(s * sub_rows, sub_rows)
            # Stream at native dtype; upcast in-register.
            x = jnp.clip(x_ref[pl.ds(r0, sub_rows), :].astype(jnp.float32),
                         eps, 1.0 - eps)
            t = t_ref[pl.ds(r0, sub_rows), :].astype(jnp.float32)
            logx = jnp.log(x)
            log1mx = jnp.log(1.0 - x)
            # == -t*log(x) - (1-t)*log(1-x), but ~3 VALU ops instead of ~5.
            loss = t * (log1mx - logx) - log1mx
            if masked:
                # Only the (single) ragged last block pays for the mask.
                row = (tile_idx * tile_rows + r0 +
                       jax.lax.broadcasted_iota(jnp.int32, loss.shape, 0))
                loss = jnp.where(row < valid_rows, loss, 0.0)
            # (sub_rows,128) -> (sub_rows//8, 8, 128) -> sum over leading axis:
            # pure vreg adds (VPU); no cross-lane XLU work in the hot loop.
            out_ref[...] += loss.reshape(sub_rows // 8, 8, LANE).sum(axis=0)
            return carry

        jax.lax.fori_loop(0, n_sub, body, 0, unroll=unroll)

    if has_ragged:
        is_ragged = tile_idx == (n_blocks - 1)

        @pl.when(jnp.logical_not(is_ragged))
        def _():
            sweep(False)

        @pl.when(is_ragged)
        def _():
            sweep(True)
    else:
        sweep(False)


def bce_loss_pallas(x, target, eps=1e-07):
    """Pallas implementation of LossBCE.forward. Returns a scalar (float32)."""
    batch_n = x.shape[0]
    total = x.size

    xf = x.reshape(-1)
    tf = target.reshape(-1)

    chunk = 8 * LANE                       # one (8,128) vreg-shaped group
    aligned = (total // chunk) * chunk     # kernel handles this prefix
    tail = total - aligned                 # <=1023 elems handled in the wrapper

    partial = jnp.float32(0.0)

    if aligned:
        rows = aligned // LANE             # multiple of 8
        x2 = xf[:aligned].reshape(rows, LANE)   # cheap contiguous slice+reshape
        t2 = tf[:aligned].reshape(rows, LANE)

        tile_rows = min(MAX_TILE_ROWS, rows)
        n_blocks = pl.cdiv(rows, tile_rows)

        # 2-way core split only when it introduces no duplicated clamped tiles
        # (and hence no wasted DMA / compute on single-TC v5e/v6e).
        ncores = NCORES if (n_blocks >= NCORES and n_blocks % NCORES == 0) else 1
        n_per_core = n_blocks // ncores

        has_ragged = (rows % tile_rows) != 0
        min_itemsize = min(x.dtype.itemsize, target.dtype.itemsize)
        sub_rows = _pick_sub_rows(tile_rows, min_align=8 * 4 // min_itemsize)

        kernel = functools.partial(
            _bce_kernel, eps=float(eps), tile_rows=tile_rows,
            sub_rows=sub_rows, n_per_core=n_per_core, n_blocks=n_blocks,
            valid_rows=rows, has_ragged=has_ragged)

        def in_map(c, i):
            return (c * n_per_core + i, 0)

        partials = pl.pallas_call(
            kernel,
            out_shape=jax.ShapeDtypeStruct((ncores * 8, LANE), jnp.float32),
            grid_spec=pltpu.PrefetchScalarGridSpec(
                num_scalar_prefetch=0,
                grid=(ncores, n_per_core),
                in_specs=[
                    pl.BlockSpec((tile_rows, LANE), in_map),
                    pl.BlockSpec((tile_rows, LANE), in_map),
                ],
                out_specs=pl.BlockSpec((8, LANE), lambda c, i: (c, 0)),
            ),
            compiler_params=pltpu.CompilerParams(
                dimension_semantics=("parallel", "arbitrary"),
                vmem_limit_bytes=VMEM_LIMIT_BYTES,
            ),
        )(x2, t2)
        partial = jnp.sum(partials)

    if tail:
        # Tiny ragged tail (<1024 elems): plain jnp, no full-array pad copy.
        xt = jnp.clip(xf[aligned:].astype(jnp.float32), eps, 1.0 - eps)
        tt = tf[aligned:].astype(jnp.float32)
        l1mx = jnp.log(1.0 - xt)
        partial = partial + jnp.sum(tt * (l1mx - jnp.log(xt)) - l1mx)

    return partial / jnp.float32(batch_n)


def bce_loss_ref(x, target, eps=1e-07):
    xc = jnp.clip(x.astype(jnp.float32), eps, 1.0 - eps)
    t = target.astype(jnp.float32)
    return (
        jnp.sum(-t * jnp.log(xc) - (1.0 - t) * jnp.log(1.0 - xc)) / x.shape[0]
    )


if __name__ == "__main__":
    key = jax.random.PRNGKey(0)

    def check(shape, target_dtype):
        k1, k2, _ = jax.random.split(jax.random.fold_in(key, shape[-1]), 3)
        x = jax.random.uniform(k1, shape, dtype=jnp.float32)      # probs in [0,1)
        t = jax.random.bernoulli(k2, 0.5, shape).astype(target_dtype)
        loss = bce_loss_pallas(x, t)
        jax.block_until_ready(loss)
        ref = bce_loss_ref(x, t)
        assert jnp.allclose(loss, ref, rtol=1e-3, atol=1e-3), (shape, loss, ref)

    # Main demo: small (N, C, H, W) prediction/target pair.
    check((2, 4, 16, 16), jnp.float32)
    # Non-multiple-of-1024 total: exercises the jnp ragged-tail path.
    check((3, 5, 7, 11), jnp.float32)
    # Larger input with bf16 target: multi-block, 2-way core split, ragged
    # last block, narrow-dtype streaming with in-kernel upcast.
    check((6, 16, 128, 128), jnp.bfloat16)

    print("KERNEL_OK")
</pallas_src>

<mosaic_0001>
module attributes {stable_mosaic.version = 11 : i64} {
  func.func @_bce_kernel(%arg0: i32, %arg1: i32, %arg2: memref<16x128xf32, #tpu.memory_space<vmem>>, %arg3: memref<16x128xf32, #tpu.memory_space<vmem>>, %arg4: memref<8x128xf32, #tpu.memory_space<vmem>>) attributes {dimension_semantics = [#tpu.dimension_semantics<parallel>, #tpu.dimension_semantics<arbitrary>], iteration_bounds = array<i64: 1, 1>, scalar_prefetch = 0 : i64, scratch_operands = 0 : i64, tpu.core_type = #tpu.core_type<tc>, window_params = [{transform_indices = @transform_0, window_bounds = array<i64: 16, 128>}, {transform_indices = @transform_1, window_bounds = array<i64: 16, 128>}, {transform_indices = @transform_2, window_bounds = array<i64: 8, 128>}]} {
    %c0_i32 = arith.constant 0 : i32
    %0 = arith.cmpi eq, %arg1, %c0_i32 : i32
    %1 = arith.extui %0 : i1 to i32
    %c0_i32_0 = arith.constant 0 : i32
    %2 = arith.cmpi ne, %1, %c0_i32_0 : i32
    scf.if %2 {
      %cst_10 = arith.constant 0.000000e+00 : f32
      %25 = vector.broadcast %cst_10 : f32 to vector<8x128xf32>
      %c0_11 = arith.constant 0 : index
      %c0_12 = arith.constant 0 : index
      %26 = vector.load %arg4[%c0_11, %c0_12] : memref<8x128xf32, #tpu.memory_space<vmem>>, vector<8x128xf32>
      tpu.vector_store %arg4[%c0_11, %c0_12], %25 {strides = array<i32>} : memref<8x128xf32, #tpu.memory_space<vmem>>, vector<8x128xf32>,
    } else {
    }
    %c0_i32_1 = arith.constant 0 : i32
    %c16_i32 = arith.constant 16 : i32
    %3 = arith.muli %c0_i32_1, %c16_i32 : i32
    %4 = tpu.assume_multiple %3, 16 : i32
    %5 = arith.index_cast %4 : i32 to index
    %c0 = arith.constant 0 : index
    %6 = vector.load %arg2[%5, %c0] : memref<16x128xf32, #tpu.memory_space<vmem>>, vector<16x128xf32>
    %cst = arith.constant 1.000000e-07 : f32
    %cst_2 = arith.constant 0.99999988 : f32
    %7 = vector.broadcast %cst : f32 to vector<16x128xf32>
    %8 = arith.maximumf %7, %6 : vector<16x128xf32>
    %9 = vector.broadcast %cst_2 : f32 to vector<16x128xf32>
    %10 = arith.minimumf %9, %8 : vector<16x128xf32>
    %11 = arith.index_cast %4 : i32 to index
    %c0_3 = arith.constant 0 : index
    %12 = vector.load %arg3[%11, %c0_3] : memref<16x128xf32, #tpu.memory_space<vmem>>, vector<16x128xf32>
    %13 = math.log %10 : vector<16x128xf32>
    %cst_4 = arith.constant 1.000000e+00 : f32
    %14 = vector.broadcast %cst_4 : f32 to vector<16x128xf32>
    %15 = arith.subf %14, %10 : vector<16x128xf32>
    %16 = math.log %15 : vector<16x128xf32>
    %17 = arith.subf %16, %13 : vector<16x128xf32>
    %18 = arith.mulf %12, %17 : vector<16x128xf32>
    %19 = arith.subf %18, %16 : vector<16x128xf32>
    %c0_5 = arith.constant 0 : index
    %c0_6 = arith.constant 0 : index
    %20 = vector.load %arg4[%c0_5, %c0_6] : memref<8x128xf32, #tpu.memory_space<vmem>>, vector<8x128xf32>
    %21 = vector.shape_cast %19 : vector<16x128xf32> to vector<2x8x128xf32>
    %cst_7 = arith.constant dense<0.000000e+00> : vector<8x128xf32>
    %22 = vector.multi_reduction <add>, %21, %cst_7 [0] : vector<2x8x128xf32> to vector<8x128xf32>
    %23 = arith.addf %20, %22 : vector<8x128xf32>
    %c0_8 = arith.constant 0 : index
    %c0_9 = arith.constant 0 : index
    %24 = vector.load %arg4[%c0_8, %c0_9] : memref<8x128xf32, #tpu.memory_space<vmem>>, vector<8x128xf32>
    tpu.vector_store %arg4[%c0_8, %c0_9], %23 {strides = array<i32>} : memref<8x128xf32, #tpu.memory_space<vmem>>, vector<8x128xf32>,
    %c1_i32 = arith.constant 1 : i32
    return
  }
  func.func @transform_0(%arg0: i32, %arg1: i32) -> (i32, i32) {
    %c1_i32 = arith.constant 1 : i32
    %0 = arith.muli %arg0, %c1_i32 : i32
    %1 = arith.addi %0, %arg1 : i32
    %c0_i32 = arith.constant 0 : i32
    %c0_i32_0 = arith.constant 0 : i32
    return %1, %c0_i32 : i32, i32
  }
  func.func @transform_1(%arg0: i32, %arg1: i32) -> (i32, i32) {
    %c1_i32 = arith.constant 1 : i32
    %0 = arith.muli %arg0, %c1_i32 : i32
    %1 = arith.addi %0, %arg1 : i32
    %c0_i32 = arith.constant 0 : i32
    %c0_i32_0 = arith.constant 0 : i32
    return %1, %c0_i32 : i32, i32
  }
  func.func @transform_2(%arg0: i32, %arg1: i32) -> (i32, i32) {
    %c0_i32 = arith.constant 0 : i32
    %c0_i32_0 = arith.constant 0 : i32
    return %arg0, %c0_i32 : i32, i32
  }
}

</mosaic_0001>

<bundles_post_ra>
// kernel: tpu_custom_call.1
= control target key start
LH: loop header
LB: loop body
LE: loop exit
PB: predicated region body
PF: predicated region fallthrough
CT: control target
= control target key end

     0   :  { %7 = vsyncpa [#allocation3], 0  ;;  %s228_s0 = inlined_call_operand.hbm [shape: f32[16,128], index: 0, kind: input, shape index: {}]   ;;  %s229_s1 = inlined_call_operand.hbm [shape: f32[16,128], index: 1, kind: input, shape index: {}]   ;;  %s230_s2 = inlined_call_operand.hbm [shape: f32[8,128], index: 2, kind: output, shape index: {}]  }
   0x1   :  { %8 = vsyncpa [#allocation6], 0 }
   0x2   :  { %9 = vsyncpa [#allocation4], 0  ;;  %s18_s11 = sshll.u32 %s228_s0, 4  ;;  %s199_s12 = smov [#allocation2]   ;;  %s19_s11 = int_to_ptr.hbm [resolvable:$true] %s18_s11 }
   0x3   :  { %s20_s13 = sshll.u32 %s199_s12, 4  ;;  %s35_s16 = sshll.u32 %s229_s1, 4  ;;  %s21_s13 = int_to_ptr.vmem [resolvable:$true] %s20_s13  ;;  %s36_s16 = int_to_ptr.hbm [resolvable:$true] %s35_s16 }
   0x4   :  { %s200_s17 = smov 128   ;;  %s201_s18 = smov 8  }
   0x5   :  { %26 = dma.hbm_to_vmem [thread:$0]  %s19_s11, 256, %s21_s13, [#allocation3], %s200_s17, %s200_s17, %s201_s18  }
   0x6   :  { %s202_s19 = smov [#allocation5]  }
   0x7   :  { %s37_s20 = sshll.u32 %s202_s19, 4  ;;  %s38_s20 = int_to_ptr.vmem [resolvable:$true] %s37_s20 }
   0x8   :  { %43 = dma.hbm_to_vmem [thread:$0]  %s36_s16, 256, %s38_s20, [#allocation6], %s200_s17, %s200_s17, %s201_s18  }
   0x9   :  { %193 = dma.done.wait [#allocation3], 256  }
   0xa   :  { %194 = vsyncadd [#allocation3], 4294967040 }
   0xb   :  { %195 = dma.done.wait [#allocation6], 256  }
   0xc   :  { %196 = vsyncadd [#allocation6], 4294967040  ;;  %v61_v0 = vld [vmem:[#allocation2] sm:$0xff]  ;;  %v62_v1 = vld [vmem:[#allocation2 + $0x8] sm:$0xff]  ;;  %s203_s0 = smov [#allocation7]   ;;  %s96_s23 = sshll.u32 %s230_s2, 4  ;;  %s97_s23 = int_to_ptr.hbm [resolvable:$true] %s96_s23 }
   0xd   :  { %v63_v2 = vmax.f32 %v61_v0, 1e-07  ;;  %v64_v3 = vmax.f32 %v62_v1, 1e-07  ;;  %v67_v15 = vld [vmem:[#allocation5] sm:$0xff]  ;;  %v68_v17 = vld [vmem:[#allocation5 + $0x8] sm:$0xff] }
   0xe   :  { %s94_s1 = sshll.u32 %s203_s0, 4  ;;  %s95_s1 = int_to_ptr.vmem [resolvable:$true] %s94_s1 }
   0xf   :  { %v65_v4 = vmin.f32 %v63_v2, 0.9999999  ;;  %v66_v5 = vmin.f32 %v64_v3, 0.9999999 }
  0x11   :  { %113 = vlog2.f32 %v65_v4  ;;  %v73_v6 = vsub.f32 1.0, %v65_v4  ;;  %v74_v7 = vsub.f32 1.0, %v66_v5 }
  0x12   :  { %115 = vlog2.f32 %v66_v5 }
  0x13   :  { %117 = vlog2.f32 %v73_v6 }
  0x14   :  { %119 = vlog2.f32 %v74_v7 }
  0x17   :  { %v114_v8 = vpop.eup %113 }
  0x18   :  { %v116_v9 = vpop.eup %115  ;;  %v70_v10 = vmul.f32 0.6931472, %v114_v8 }
  0x19   :  { %v118_v11 = vpop.eup %117  ;;  %v72_v12 = vmul.f32 0.6931472, %v116_v9 }
  0x1a   :  { %v120_v13 = vpop.eup %119  ;;  %v76_v14 = vmul.f32 0.6931472, %v118_v11 }
  0x1b   :  { %v78_v16 = vmul.f32 0.6931472, %v120_v13 }
  0x1c   :  { %v79_v18 = vsub.f32 %v76_v14, %v70_v10 }
  0x1d   :  { %v80_v19 = vsub.f32 %v78_v16, %v72_v12 }
  0x1e   :  { %v81_v20 = vmul.f32 %v79_v18, %v67_v15 }
  0x1f   :  { %v82_v21 = vmul.f32 %v80_v19, %v68_v17 }
  0x20   :  { %v83_v22 = vsub.f32 %v81_v20, %v76_v14 }
  0x21   :  { %v84_v23 = vsub.f32 %v82_v21, %v78_v16 }
  0x23   :  { %v86_v24 = vadd.f32 %v84_v23, %v83_v22 }
  0x25   :  { %88 = vst [vmem:[#allocation7] sm:$0xff] %v86_v24 }
  0x26   :  { %99 = dma.vmem_to_hbm [thread:$0]  %s95_s1, 128, %s97_s23, [#allocation4]  }
  0x27   :  { %197 = dma.done.wait [#allocation4], 128  }
  0x28   :  { %198 = vsyncadd [#allocation4], 4294967168 }
  0x29   :  { %104 = vsyncpa [#allocation3], 1 }
  0x2a   :  { %105 = vsyncpa [#allocation6], 1 }
  0x2b   :  { %106 = vsyncpa [#allocation4], 1 }

</bundles_post_ra>
